<compile_context>
chip_gen: v6e
topology: v6e:2x2x1
jax: 0.10.0
libtpu: 0.0.40
codegen_flags: <defaults>
</compile_context>

<pallas_src>
import functools

import jax
import jax.numpy as jnp
from jax.experimental import pallas as pl
from jax.experimental.pallas import tpu as pltpu


def controller_kernel(x_ref, slab_ref, tail_ref, o_ref, *,
                      in_dim, out_dim, hidden, w2_row0):
    """Single-block kernel: whole problem resident in VMEM.

    x_ref    : (B, in_dim)                 VMEM
    slab_ref : (w2_row0 + hidden, hidden)  VMEM packed weights:
                 rows [0, in_dim)                      -> w1
                 row  in_dim                           -> b1
                 row  in_dim + 1                       -> b2
                 rows [in_dim+2, in_dim+2+out_dim)     -> w3^T
                 rows [w2_row0, w2_row0 + hidden)      -> w2
    tail_ref : (3 * out_dim,)              SMEM: [b3_eff | u_lo | u_up]
    o_ref    : (B, out_dim)                VMEM
    """
    x = x_ref[...]                                      # (B, in_dim)
    slab = slab_ref[...]

    w1 = slab[0:in_dim, :]                              # (in_dim, H)
    b1 = slab[in_dim:in_dim + 1, :]                     # (1, H)
    b2 = slab[in_dim + 1:in_dim + 2, :]                 # (1, H)
    w3t = slab[in_dim + 2:in_dim + 2 + out_dim, :]      # (out_dim, H)
    w2 = slab[w2_row0:w2_row0 + hidden, :]              # (H, H)

    # ---- Layer 1: one tiny-K MXU push (K = in_dim, padded internally).
    h = jnp.dot(x, w1, preferred_element_type=jnp.float32) + b1
    h = jnp.maximum(h, 0.0)

    # ---- Layer 2: the only real matmul (H x H) on the MXU.
    h = jnp.dot(h, w2, preferred_element_type=jnp.float32) + b2
    h = jnp.maximum(h, 0.0)

    # ---- Layer 3 + saturation: out_dim is tiny -> VPU multiply + lane reduce,
    #      bias / clamp bounds are SMEM scalars broadcast over the batch column.
    cols = []
    for j in range(out_dim):                            # static trip count
        yj = jnp.sum(h * w3t[j:j + 1, :], axis=-1, keepdims=True)   # (B, 1)
        uj = yj + tail_ref[j]                                        # + b3_eff[j]
        uj = jnp.maximum(uj, tail_ref[out_dim + j])                  # u_lo[j]
        uj = jnp.minimum(uj, tail_ref[2 * out_dim + j])              # u_up[j]
        cols.append(uj)
    o_ref[...] = cols[0] if out_dim == 1 else jnp.concatenate(cols, axis=-1)


def make_controller(params, x_eq, u_eq, u_lo, u_up):
    """Builds the controller ONCE: folds the equilibrium pass into an effective
    last-layer bias, packs all weights into a single VMEM slab and the three
    tiny vectors into an SMEM tail, and returns a jitted function of x."""
    in_dim, hidden = params["w1"].shape
    out_dim = params["w3"].shape[1]
    hp = jax.lax.Precision.HIGHEST

    # --- one-time equilibrium fold (exact f32 to match in-kernel accumulation) ---
    def mlp(z):
        h = jnp.maximum(jnp.dot(z, params["w1"], precision=hp,
                                preferred_element_type=jnp.float32) + params["b1"], 0.0)
        h = jnp.maximum(jnp.dot(h, params["w2"], precision=hp,
                                preferred_element_type=jnp.float32) + params["b2"], 0.0)
        return jnp.dot(h, params["w3"], precision=hp,
                       preferred_element_type=jnp.float32) + params["b3"]

    y_eq = mlp(x_eq.reshape(1, -1))[0]                       # (out_dim,)
    b3_eff = params["b3"] - y_eq + u_eq                      # (out_dim,)

    # --- one-time packing of the weight slab and the SMEM tail ---
    head_rows = in_dim + 2 + out_dim
    head_pad = (-head_rows) % 8                              # sublane-align w2 start
    w2_row0 = head_rows + head_pad
    slab = jnp.concatenate(
        [params["w1"],
         params["b1"][None, :],
         params["b2"][None, :],
         params["w3"].T,
         jnp.zeros((head_pad, hidden), jnp.float32),
         params["w2"]],
        axis=0).astype(jnp.float32)                          # (w2_row0 + H, H)
    tail = jnp.concatenate([b3_eff, u_lo, u_up]).astype(jnp.float32)   # (3*out_dim,)

    kern = functools.partial(controller_kernel, in_dim=in_dim, out_dim=out_dim,
                             hidden=hidden, w2_row0=w2_row0)
    vmem = pl.BlockSpec(memory_space=pltpu.MemorySpace.VMEM)
    smem = pl.BlockSpec(memory_space=pltpu.MemorySpace.SMEM)

    @jax.jit
    def controller(x):
        B = x.shape[0]
        return pl.pallas_call(
            kern,
            out_shape=jax.ShapeDtypeStruct((B, out_dim), jnp.float32),
            in_specs=[vmem, vmem, smem],
            out_specs=vmem,
        )(x, slab, tail)

    return controller


def _reference(x, x_eq, params, u_eq, u_lo, u_up):
    """Pure-JAX reference matching the original PyTorch forward exactly."""
    hp = jax.lax.Precision.HIGHEST

    def mlp(z):
        h = jnp.maximum(jnp.dot(z, params["w1"], precision=hp) + params["b1"], 0.0)
        h = jnp.maximum(jnp.dot(h, params["w2"], precision=hp) + params["b2"], 0.0)
        return jnp.dot(h, params["w3"], precision=hp) + params["b3"]

    u = mlp(x) - mlp(x_eq.reshape(1, -1)) + u_eq
    f1 = jnp.maximum(u - u_lo, 0.0) + u_lo
    return -(jnp.maximum(u_up - f1, 0.0) - u_up)


if __name__ == "__main__":
    # Shapes consistent with the module defaults: in_dim=2, out_dim=1, hidden_dim=64.
    B, in_dim, hidden_dim, out_dim = 8, 2, 64, 1

    key = jax.random.PRNGKey(0)
    k = jax.random.split(key, 8)

    params = {
        "w1": jax.random.normal(k[0], (in_dim, hidden_dim), jnp.float32) * 0.5,
        "b1": jax.random.normal(k[1], (hidden_dim,), jnp.float32) * 0.1,
        "w2": jax.random.normal(k[2], (hidden_dim, hidden_dim), jnp.float32) * 0.2,
        "b2": jax.random.normal(k[3], (hidden_dim,), jnp.float32) * 0.1,
        "w3": jax.random.normal(k[4], (hidden_dim, out_dim), jnp.float32) * 0.2,
        "b3": jax.random.normal(k[5], (out_dim,), jnp.float32) * 0.1,
    }

    x = jax.random.normal(k[6], (B, in_dim), jnp.float32)
    x_eq = jnp.zeros((in_dim,), jnp.float32)
    u_lo = jnp.full((out_dim,), -0.5, jnp.float32)
    u_up = jnp.full((out_dim,), 0.5, jnp.float32)
    u_eq = jnp.zeros((out_dim,), jnp.float32)   # within [u_lo, u_up]

    controller = make_controller(params, x_eq, u_eq, u_lo, u_up)  # one-time build
    out = jax.block_until_ready(controller(x))                    # hot path

    ref = _reference(x, x_eq, params, u_eq, u_lo, u_up)
    assert out.shape == (B, out_dim)
    assert jnp.allclose(out, ref, atol=1e-5, rtol=1e-5)

    # TODO(synk): 'resnet' arch variant of the module is not implemented (only 'ff').
    print("KERNEL_OK")
</pallas_src>

<mosaic_0001>
module attributes {stable_mosaic.version = 11 : i64} {
  func.func @controller_kernel(%arg0: memref<8x2xf32, #tpu.memory_space<vmem>>, %arg1: memref<72x64xf32, #tpu.memory_space<vmem>>, %arg2: memref<3xf32, #tpu.memory_space<smem>>, %arg3: memref<8x1xf32, #tpu.memory_space<vmem>>) attributes {dimension_semantics = [], scalar_prefetch = 0 : i64, scratch_operands = 0 : i64, tpu.core_type = #tpu.core_type<tc>} {
    %c0 = arith.constant 0 : index
    %c0_0 = arith.constant 0 : index
    %0 = vector.load %arg0[%c0, %c0_0] : memref<8x2xf32, #tpu.memory_space<vmem>>, vector<8x2xf32>
    %c0_1 = arith.constant 0 : index
    %c0_2 = arith.constant 0 : index
    %1 = vector.load %arg1[%c0_1, %c0_2] : memref<72x64xf32, #tpu.memory_space<vmem>>, vector<72x64xf32>
    %2 = vector.extract_strided_slice %1 {offsets = [0, 0], sizes = [2, 64], strides = [1, 1]} : vector<72x64xf32> to vector<2x64xf32>
    %3 = vector.extract_strided_slice %1 {offsets = [2, 0], sizes = [1, 64], strides = [1, 1]} : vector<72x64xf32> to vector<1x64xf32>
    %4 = vector.extract_strided_slice %1 {offsets = [3, 0], sizes = [1, 64], strides = [1, 1]} : vector<72x64xf32> to vector<1x64xf32>
    %5 = vector.extract_strided_slice %1 {offsets = [4, 0], sizes = [1, 64], strides = [1, 1]} : vector<72x64xf32> to vector<1x64xf32>
    %6 = vector.extract_strided_slice %1 {offsets = [8, 0], sizes = [64, 64], strides = [1, 1]} : vector<72x64xf32> to vector<64x64xf32>
    %cst = arith.constant dense<0.000000e+00> : vector<8x64xf32>
    %7 = tpu.matmul %0, %2, %cst {dimension_numbers = #tpu.dot_dimension_numbers<[1], [0], [0], [1], [0, 0, 1, 1], [], []>} : vector<8x2xf32>, vector<2x64xf32>, vector<8x64xf32> -> vector<8x64xf32>
    %8 = vector.broadcast %3 : vector<1x64xf32> to vector<8x64xf32>
    %9 = arith.addf %7, %8 : vector<8x64xf32>
    %cst_3 = arith.constant 0.000000e+00 : f32
    %10 = vector.broadcast %cst_3 : f32 to vector<8x64xf32>
    %11 = arith.maximumf %9, %10 : vector<8x64xf32>
    %cst_4 = arith.constant dense<0.000000e+00> : vector<8x64xf32>
    %12 = tpu.matmul %11, %6, %cst_4 {dimension_numbers = #tpu.dot_dimension_numbers<[1], [0], [0], [1], [0, 0, 1, 1], [], []>} : vector<8x64xf32>, vector<64x64xf32>, vector<8x64xf32> -> vector<8x64xf32>
    %13 = vector.broadcast %4 : vector<1x64xf32> to vector<8x64xf32>
    %14 = arith.addf %12, %13 : vector<8x64xf32>
    %cst_5 = arith.constant 0.000000e+00 : f32
    %15 = vector.broadcast %cst_5 : f32 to vector<8x64xf32>
    %16 = arith.maximumf %14, %15 : vector<8x64xf32>
    %17 = vector.broadcast %5 : vector<1x64xf32> to vector<8x64xf32>
    %18 = arith.mulf %16, %17 : vector<8x64xf32>
    %cst_6 = arith.constant dense<0.000000e+00> : vector<8xf32>
    %19 = vector.multi_reduction <add>, %18, %cst_6 [1] : vector<8x64xf32> to vector<8xf32>
    %20 = vector.shape_cast %19 : vector<8xf32> to vector<8x1xf32>
    %c0_7 = arith.constant 0 : index
    %21 = memref.load %arg2[%c0_7] : memref<3xf32, #tpu.memory_space<smem>>
    %22 = vector.broadcast %21 : f32 to vector<8x1xf32>
    %23 = arith.addf %20, %22 : vector<8x1xf32>
    %c1 = arith.constant 1 : index
    %24 = memref.load %arg2[%c1] : memref<3xf32, #tpu.memory_space<smem>>
    %25 = vector.broadcast %24 : f32 to vector<8x1xf32>
    %26 = arith.maximumf %23, %25 : vector<8x1xf32>
    %c2 = arith.constant 2 : index
    %27 = memref.load %arg2[%c2] : memref<3xf32, #tpu.memory_space<smem>>
    %28 = vector.broadcast %27 : f32 to vector<8x1xf32>
    %29 = arith.minimumf %26, %28 : vector<8x1xf32>
    %c0_8 = arith.constant 0 : index
    %c0_9 = arith.constant 0 : index
    %30 = vector.load %arg3[%c0_8, %c0_9] : memref<8x1xf32, #tpu.memory_space<vmem>>, vector<8x1xf32>
    tpu.vector_store %arg3[%c0_8, %c0_9], %29 {strides = array<i32>} : memref<8x1xf32, #tpu.memory_space<vmem>>, vector<8x1xf32>,
    return
  }
}

</mosaic_0001>

<bundles_post_ra>
// kernel: controller.1
= control target key start
LH: loop header
LB: loop body
LE: loop exit
PB: predicated region body
PF: predicated region fallthrough
CT: control target
= control target key end

     0   :  { %8 = vsyncpa [#allocation3], 0  ;;  %s358_s0 = inlined_call_operand.vmem [shape: f32[8,2], index: 0, kind: input, shape index: {}]   ;;  %s359_s1 = inlined_call_operand.hbm [shape: f32[72,64], index: 1, kind: input, shape index: {}]   ;;  %s360_s2 = inlined_call_operand.vmem [shape: f32[3], index: 2, kind: input, shape index: {}]   ;;  %s361_s3 = inlined_call_operand.vmem [shape: f32[8,1], index: 3, kind: output, shape index: {}]  }
   0x1   :  { %9 = vsyncpa [#allocation4], 0  ;;  %s320_s12 = smov [#allocation2]   ;;  %s30_s16 = sshll.u32 %s360_s2, 4  ;;  %s31_s16 = int_to_ptr.vmem [resolvable:$true] %s30_s16 }
   0x2   :  { %s17_s13 = sshll.u32 %s320_s12, 4  ;;  %s18_s13 = int_to_ptr.vmem [resolvable:$true] %s17_s13 }
   0x3   :  { %s292_s17 = scalar_lea.vmem %s18_s13, 1152  ;;  %p297_p1 = scmp.lt.s32.totalorder %s18_s13, %s18_s13 }
   0x4   :  { %p293_p0 = scmp.ne.s32.totalorder %s18_s13, %s292_s17  ;;  %p298_p2 = scmp.lt.s32.totalorder %s292_s17, %s292_s17 }
   0x6   :  { %p299_p3 = por %p298_p2, %p297_p1 }
   0x8   :  { %p300_p4 = pnand %p299_p3, %p293_p0 }
   0xa   :  { %303 = shalt.err (!%p300_p4)
}
   0xb   :  { %s321_s18 = smov 128   ;;  %s322_s19 = smov 8  }
   0xc   :  { %23 = dma.hbm_to_vmem [thread:$0]  %s359_s1, 1152, %s18_s13, [#allocation3], %s321_s18, %s321_s18, %s322_s19  }
   0xd   :  { %s304_s22 = scalar_lea.vmem %s31_s16, 16  ;;  %p309_p6 = scmp.lt.s32.totalorder %s31_s16, %s31_s16 }
   0xe   :  { %p305_p5 = scmp.ne.s32.totalorder %s31_s16, %s304_s22  ;;  %p310_p7 = scmp.lt.s32.totalorder %s304_s22, %s304_s22 }
  0x10   :  { %p311_p8 = por %p310_p7, %p309_p6 }
  0x12   :  { %p312_p9 = pnand %p311_p8, %p305_p5 }
  0x14   :  { %315 = shalt.err (!%p312_p9)
}
  0x15   :  { %s323_s2 = smov [#allocation5]  }
  0x16   :  { %33 = dma.vmem_to_smem %s31_s16, 16, %s323_s2, [#allocation4]  }
  0x17   :  { %316 = dma.done.wait [#allocation3], 1152  }
  0x18   :  { %317 = vsyncadd [#allocation3], 4294966144 }
  0x19   :  { %318 = dma.done.wait [#allocation4], 16  }
  0x1a   :  { %319 = vsyncadd [#allocation4], 4294967280 }
  0x1b   :  { %40 = sfence }
  0x1c   :  { %v42_v0 = vld [vmem:[#allocation2] sm:$0xff]  ;;  %vm59_vm0 = vcmask 1041408   ;;  %vm55_vm1 = vcmask 15360   ;;  %v324_v2 = vmov 0.0   ;;  %vm325_vm2 = vmmov 0   ;;  %v49_v4 = vld [vmem:[#allocation2 + $0x38] sm:$0xff] }
  0x1d   :  { %v41_v1 = vld [vmem:[%s358_s0] sm:$0xff]  ;;  %254 = vmatprep.subr.mxu0 %v324_v2  ;;  %256 = vmatprep.mubr.msk.f32.mxu0 %vm325_vm2, %v324_v2  ;;  %v48_v5 = vld [vmem:[#allocation2 + $0x30] sm:$0xff]  ;;  %v47_v6 = vld [vmem:[#allocation2 + $0x28] sm:$0xff]  ;;  %v51_v11 = vlaneseq  ;;  %vm138_vm3 = vcmask 523264   ;;  %s221_s0 = sld [smem:[#allocation5]]  ;;  %vm230_vm4 = vcmask 7168  }
  0x1e   :  { %v50_v3 = vld [vmem:[#allocation2 + $0x40] sm:$0xff]  ;;  %255 = vmatpush3.msk.msra.mxu0 %vm59_vm0, %v42_v0  ;;  %259 = vmatprep.subr.mxu1 %v324_v2  ;;  %v45_v8 = vld [vmem:[#allocation2 + $0x18] sm:$0xff]  ;;  %v44_v9 = vld [vmem:[#allocation2 + $0x10] sm:$0xff]  ;;  %s241_s1 = sld [smem:[#allocation5 + $0x1]] }
  0x1f   :  { %257 = vmatmul.mubr.msk.f32.vlgmr.msra.gmra.mxu0 %vm55_vm1, %v41_v1  ;;  %260 = vmatpush3.msra.mxu1 %v50_v3  ;;  %v46_v7 = vld [vmem:[#allocation2 + $0x20] sm:$0xff]  ;;  %v43_v10 = vld [vmem:[#allocation2 + $0x8] sm:$0xff]  ;;  %v52_v12 = vshrl.u32 %v51_v11, 7  ;;  %s242_s25 = sld [smem:[#allocation5 + $0x2]] }
  0x20   :  { %261 = vmatprep.subr.mxu1 %v324_v2  ;;  %275 = vmatprep.mubr.msk.f32.mxu1 %vm325_vm2, %v324_v2 }
  0x21   :  { %262 = vmatpush3.msra.mxu1 %v49_v4  ;;  %v53_v13 = vsub.s32 2, %v52_v12  ;;  %v136_v19 = vsub.s32 3, %v52_v12  ;;  %v215_v21 = vsub.s32 4, %v52_v12 }
  0x22   :  { %263 = vmatprep.subr.mxu1 %v324_v2 }
  0x23   :  { %264 = vmatpush3.msra.mxu1 %v48_v5  ;;  %v54_v14 = vrot.slane %v42_v0, %v53_v13  ;;  %v137_v20 = vrot.slane %v42_v0, %v136_v19  ;;  %v216_v24 = vrot.slane %v42_v0, %v215_v21  ;;  %v222_v29 = vstv %s221_s0 }
  0x24   :  { %265 = vmatprep.subr.mxu1 %v324_v2  ;;  %v225_v31 = vstv %s241_s1 }
  0x25   :  { %266 = vmatpush3.msra.mxu1 %v47_v6  ;;  %v228_v33 = vstv %s242_s25 }
  0x26   :  { %267 = vmatprep.subr.mxu1 %v324_v2 }
  0x27   :  { %268 = vmatpush3.msra.mxu1 %v46_v7 }
  0x28   :  { %269 = vmatprep.subr.mxu1 %v324_v2 }
  0x29   :  { %270 = vmatpush3.msra.mxu1 %v45_v8 }
  0x2a   :  { %271 = vmatprep.subr.mxu1 %v324_v2 }
  0x2b   :  { %272 = vmatpush3.msra.mxu1 %v44_v9 }
  0x2c   :  { %273 = vmatprep.subr.mxu1 %v324_v2 }
  0x2d   :  { %274 = vmatpush3.msra.mxu1 %v43_v10 }
  0xdf   :  { %v129_v15 = vpop.f32.mrf.mxu0 }
  0xe0   :  { %v130_v16 = vadd.f32 %v129_v15, %v54_v14 }
  0xe1   :  { %v258_v17 = vpop.f32.mrf.mxu0 }
  0xe2   :  { %v133_v18 = vmax.f32 %v130_v16, 0.0 }
  0xe4   :  { %276 = vmatmul.mubr.msk.f32.vlgmr.msra.gmra.mxu1 %vm138_vm3, %v133_v18 }
 0x1a4   :  { %v208_v22 = vpop.f32.mrf.mxu1 }
 0x1a5   :  { %v209_v23 = vadd.f32 %v208_v22, %v137_v20 }
 0x1a6   :  { %v277_v25 = vpop.f32.mrf.mxu1 }
 0x1a7   :  { %v212_v26 = vmax.f32 %v209_v23, 0.0 }
 0x1a9   :  { %v217_v27 = vmul.f32 %v216_v24, %v212_v26 }
 0x1ab   :  { %v218_v28 = vsel %vm138_vm3, %v217_v27, 0.0 }
 0x1ac   :  { %219 = vadd.xlane.f32.xlu0 %v218_v28 }
 0x235   :  { %v220_v30 = vpop.xlane.xlu0 %219 }
 0x236   :  { %v223_v32 = vadd.f32 %v222_v29, %v220_v30 }
 0x238   :  { %v226_v34 = vmax.f32 %v223_v32, %v225_v31 }
 0x23a   :  { %v229_v35 = vmin.f32 %v226_v34, %v228_v33 }
 0x23c   :  { %231 = vst.msk [vmem:[%s361_s3] sm:$0xff] %vm230_vm4, %v229_v35 }
 0x23d   :  { %236 = vsyncpa [#allocation3], 1 }
 0x23e   :  { %237 = vsyncpa [#allocation4], 1 }

</bundles_post_ra>
